<compile_context>
chip_gen: v5e
topology: v5e:2x2
jax: 0.10.0
libtpu: 0.0.40
codegen_flags: <defaults>
</compile_context>

<pallas_src>
import numpy as np
import jax
import jax.numpy as jnp
from jax.experimental import pallas as pl
from jax.experimental.pallas import tpu as pltpu

DT_LOOKUP = 5e-05   # I_ext sampling step used by forward()'s int(t // 5e-5)
LANES = 128         # TPU lane width
ROW_TILE = 8        # sublanes per f32 vreg -> one full (8,128) vreg per tile
                    # (raise for very large batches to amortize per-step cost;
                    #  on v7x budget tiles against 64 MiB VMEM)

# Packed scalar layout (SMEM):
#   0 V_rest  1 V_reset  2 V_T       3 V_thres  4 delta_T  5 R      6 a
#   7 1/tau   8 1/tau_w  9 1/delta_T 10 1/step  11 b/step  12 step  13 R*I_t


def pack_scalars(params, RI_t=0.0):
    (V_rest, V_reset, V_T, V_thres, delta_T, R,
     tau, tau_w, a, b, step) = [params[i] for i in range(11)]
    return jnp.stack([
        V_rest, V_reset, V_T, V_thres, delta_T, R, a,
        1.0 / tau, 1.0 / tau_w, 1.0 / delta_T, 1.0 / step, b / step,
        step, jnp.asarray(RI_t, jnp.float32),
    ]).astype(jnp.float32)


def _iext_index(t, n):
    """Index int(t // 5e-5), computed like PyTorch (float64) when t is concrete,
    clipped to the valid range of I_ext."""
    if isinstance(t, (int, float, np.floating, np.integer)):
        idx = int(np.float64(t) // np.float64(DT_LOOKUP))
    else:
        # traced time: best-effort f32 floor division
        idx = jnp.floor(jnp.asarray(t, jnp.float32) /
                        np.float32(DT_LOOKUP)).astype(jnp.int32)
    return jnp.clip(jnp.asarray(idx, jnp.int32), 0, n - 1)


def _pack_state(V, w, V_rest):
    """Stack V/w into a sublane-dense (2, rows, 128) f32 block (rows % 8 == 0).
    Padded lanes hold (V_rest, 0) so the exp() stays benign."""
    B = V.shape[0]
    chunk = ROW_TILE * LANES
    Bp = ((B + chunk - 1) // chunk) * chunk
    rows = Bp // LANES
    Vp = jnp.full((Bp,), V_rest, dtype=jnp.float32).at[:B].set(V.astype(jnp.float32))
    wp = jnp.zeros((Bp,), dtype=jnp.float32).at[:B].set(w.astype(jnp.float32))
    state = jnp.stack([Vp.reshape(rows, LANES), wp.reshape(rows, LANES)])
    return state, Bp, rows


# ----------------------------------------------------------------------------
# Kernel 1: single derivative evaluation (the module's forward pass)
# ----------------------------------------------------------------------------
def adex_forward_kernel(scal_ref, state_ref, out_ref):
    V_rest      = scal_ref[0]
    V_reset     = scal_ref[1]
    V_T         = scal_ref[2]
    V_thres     = scal_ref[3]
    delta_T     = scal_ref[4]
    R           = scal_ref[5]
    a           = scal_ref[6]
    inv_tau     = scal_ref[7]
    inv_tau_w   = scal_ref[8]
    inv_delta_T = scal_ref[9]
    inv_step    = scal_ref[10]
    b_over_step = scal_ref[11]
    RI_t        = scal_ref[13]          # R * I_ext[int(t // 5e-5)], precomputed

    V = state_ref[0]                    # (ROW_TILE, 128)
    w = state_ref[1]

    # Only exp() hits the EUP; everything else is VPU multiplies/adds.
    dvdt = (-(V - V_rest) + delta_T * jnp.exp((V - V_T) * inv_delta_T)
            - R * w + RI_t) * inv_tau
    dwdt = (a * (V - V_rest) - w) * inv_tau_w

    spiking = V > V_thres
    dvdt = jnp.where(spiking, (V_reset - V) * inv_step, dvdt)
    dwdt = jnp.where(spiking, dwdt + b_over_step, dwdt)

    out_ref[0] = dvdt
    out_ref[1] = dwdt


def adex_forward(t, V, w, params, I_ext):
    """Pallas AdEx.forward.  V, w: (B,) -> (dvdt, dwdt): (B,) float32."""
    B = V.shape[0]
    idx = _iext_index(t, I_ext.shape[0])
    RI_t = params[5] * I_ext[idx]               # gather done in the wrapper
    scal = pack_scalars(params, RI_t)
    state, Bp, rows = _pack_state(V, w, params[0])

    out = pl.pallas_call(
        adex_forward_kernel,
        out_shape=jax.ShapeDtypeStruct((2, rows, LANES), jnp.float32),
        grid=(rows // ROW_TILE,),
        in_specs=[pl.BlockSpec(memory_space=pltpu.MemorySpace.SMEM),
                  pl.BlockSpec((2, ROW_TILE, LANES), lambda i: (0, i, 0))],
        out_specs=pl.BlockSpec((2, ROW_TILE, LANES), lambda i: (0, i, 0)),
        compiler_params=pltpu.CompilerParams(
            dimension_semantics=("parallel",)),     # both TCs on v7x
    )(scal, state)

    dv = out[0].reshape(Bp)[:B]
    dw = out[1].reshape(Bp)[:B]
    return dv, dw


# ----------------------------------------------------------------------------
# Kernel 2: fused explicit-Euler time loop (state resident in VMEM scratch)
# ----------------------------------------------------------------------------
def adex_euler_kernel(scal_ref, ri_ref, init_ref, trace_ref, state_sc):
    k = pl.program_id(0)

    @pl.when(k == 0)
    def _():
        state_sc[...] = init_ref[...]

    V_rest      = scal_ref[0]
    V_reset     = scal_ref[1]
    V_T         = scal_ref[2]
    V_thres     = scal_ref[3]
    delta_T     = scal_ref[4]
    R           = scal_ref[5]
    a           = scal_ref[6]
    inv_tau     = scal_ref[7]
    inv_tau_w   = scal_ref[8]
    inv_delta_T = scal_ref[9]
    inv_step    = scal_ref[10]
    b_over_step = scal_ref[11]
    dt          = scal_ref[12]

    RI_t = ri_ref[k]                     # scalar SMEM read: R * I_ext[idx(t_k)]

    V = state_sc[0]
    w = state_sc[1]

    # odeint convention: trace[k] is the state at t_k (before the update)
    trace_ref[0, 0, :, :] = V
    trace_ref[0, 1, :, :] = w

    dvdt = (-(V - V_rest) + delta_T * jnp.exp((V - V_T) * inv_delta_T)
            - R * w + RI_t) * inv_tau
    dwdt = (a * (V - V_rest) - w) * inv_tau_w
    spiking = V > V_thres
    dvdt = jnp.where(spiking, (V_reset - V) * inv_step, dvdt)
    dwdt = jnp.where(spiking, dwdt + b_over_step, dwdt)

    state_sc[0] = V + dt * dvdt
    state_sc[1] = w + dt * dwdt


def _euler_current(params, I_ext, t0, n_steps):
    """Per-step R * I_ext[int(t_k // 5e-5)], index computed in float64 like PyTorch."""
    t_steps = np.float64(t0) + np.arange(n_steps, dtype=np.float64) * np.float64(DT_LOOKUP)
    idx = np.clip((t_steps // np.float64(DT_LOOKUP)).astype(np.int64),
                  0, I_ext.shape[0] - 1)
    return (params[5] * I_ext[jnp.asarray(idx)]).astype(jnp.float32)


def adex_simulate_euler(V0, w0, params, I_ext, t0, n_steps):
    """Fused Euler integration of the AdEx ODE: the full time loop runs inside a
    single pallas_call (grid over time), V/w stay on-chip the whole time."""
    B = V0.shape[0]
    ri_steps = _euler_current(params, I_ext, t0, n_steps)   # (n_steps,) SMEM
    scal = pack_scalars(params)
    init, Bp, rows = _pack_state(V0, w0, params[0])

    trace = pl.pallas_call(
        adex_euler_kernel,
        out_shape=jax.ShapeDtypeStruct((n_steps, 2, rows, LANES), jnp.float32),
        grid=(n_steps,),
        in_specs=[pl.BlockSpec(memory_space=pltpu.MemorySpace.SMEM),
                  pl.BlockSpec(memory_space=pltpu.MemorySpace.SMEM),
                  pl.BlockSpec((2, rows, LANES), lambda k: (0, 0, 0))],
        out_specs=pl.BlockSpec((1, 2, rows, LANES), lambda k: (k, 0, 0, 0)),
        scratch_shapes=[pltpu.VMEM((2, rows, LANES), jnp.float32)],
        compiler_params=pltpu.CompilerParams(
            dimension_semantics=("arbitrary",)),    # sequential time dependence
    )(scal, ri_steps, init)

    V_trace = trace[:, 0].reshape(n_steps, Bp)[:, :B]
    w_trace = trace[:, 1].reshape(n_steps, Bp)[:, :B]
    return V_trace, w_trace


# ----------------------------------------------------------------------------
# Module constants + pure-JAX references for correctness checks
# ----------------------------------------------------------------------------
def make_adex_params_and_iext(V_rest=-0.068):
    """Deterministic parameter / I_ext construction, mirroring AdEx.__init__."""
    params = jnp.asarray([
        V_rest,   # V_rest
        -0.068,   # V_reset
        -0.045,   # V_T
        0.02,     # V_thres
        0.01,     # delta_T
        1.8e9,    # R
        0.025,    # tau
        0.02,     # tau_w
        9e-11,    # a
        2e-12,    # b
        5e-05,    # step_size
    ], dtype=jnp.float32)

    n_t = np.arange(0, 2, 5e-05).shape[0]          # 40000
    np_I = np.zeros(n_t + 5, dtype=np.float32)     # 40005
    np_I[5561:11561] = -2e-11
    np_I[11561:25561] = 2e-11
    I_ext = jnp.asarray(np_I)
    return params, I_ext


def adex_forward_ref(t, V, w, params, I_ext):
    (V_rest, V_reset, V_T, V_thres, delta_T, R,
     tau, tau_w, a, b, step) = [params[i] for i in range(11)]
    I_t = I_ext[_iext_index(t, I_ext.shape[0])]
    dvdt = (-(V - V_rest) + delta_T * jnp.exp((V - V_T) / delta_T)
            - R * w + R * I_t) / tau
    dwdt = (a * (V - V_rest) - w) / tau_w
    spiking = V > V_thres
    dvdt = jnp.where(spiking, (V_reset - V) / step, dvdt)
    dwdt = jnp.where(spiking, dwdt + b / step, dwdt)
    return dvdt, dwdt


def adex_simulate_euler_ref(V0, w0, params, I_ext, t0, n_steps):
    (V_rest, V_reset, V_T, V_thres, delta_T, R,
     tau, tau_w, a, b, step) = [params[i] for i in range(11)]
    ri_steps = _euler_current(params, I_ext, t0, n_steps)

    def step_fn(carry, RI_t):
        V, w = carry
        dvdt = (-(V - V_rest) + delta_T * jnp.exp((V - V_T) / delta_T)
                - R * w + RI_t) / tau
        dwdt = (a * (V - V_rest) - w) / tau_w
        spiking = V > V_thres
        dvdt = jnp.where(spiking, (V_reset - V) / step, dvdt)
        dwdt = jnp.where(spiking, dwdt + b / step, dwdt)
        return (V + step * dvdt, w + step * dwdt), (V, w)

    (_, _), (Vt, wt) = jax.lax.scan(
        step_fn, (V0.astype(jnp.float32), w0.astype(jnp.float32)), ri_steps)
    return Vt, wt


if __name__ == "__main__":
    key = jax.random.PRNGKey(0)
    k1, k2 = jax.random.split(key)

    params, I_ext = make_adex_params_and_iext()

    # ---- 1) single-step forward (the nn.Module forward pass) ---------------
    B = 128   # batch of membrane states along the lane dim (original module: B=1)
    V = (-0.068 + 0.05 * jax.random.normal(k1, (B,))).astype(jnp.float32)
    w = (1e-11 * jax.random.normal(k2, (B,))).astype(jnp.float32)
    t = 0.3   # inside the -2e-11 segment of I_ext

    dv, dw = adex_forward(t, V, w, params, I_ext)
    jax.block_until_ready((dv, dw))
    dv_ref, dw_ref = adex_forward_ref(t, V, w, params, I_ext)
    assert jnp.allclose(dv, dv_ref, rtol=1e-4, atol=1e-5), "dvdt mismatch"
    assert jnp.allclose(dw, dw_ref, rtol=1e-4, atol=1e-11), "dwdt mismatch"

    # ---- 2) fused Euler time loop (one pallas_call for the whole trace) ----
    n_steps = 256
    t0 = 5561 * 5e-05                 # start inside the hyperpolarizing segment
    V0 = jnp.full((1,), -0.068, jnp.float32)   # module's V_initial / w_initial
    w0 = jnp.zeros((1,), jnp.float32)

    Vt, wt = adex_simulate_euler(V0, w0, params, I_ext, t0, n_steps)
    jax.block_until_ready((Vt, wt))
    Vt_ref, wt_ref = adex_simulate_euler_ref(V0, w0, params, I_ext, t0, n_steps)
    assert jnp.allclose(Vt, Vt_ref, rtol=1e-3, atol=1e-5), "V trace mismatch"
    assert jnp.allclose(wt, wt_ref, rtol=1e-3, atol=1e-12), "w trace mismatch"

    print("KERNEL_OK")
</pallas_src>

<mosaic_0001>
module attributes {stable_mosaic.version = 11 : i64} {
  func.func @adex_forward_kernel(%arg0: i32, %arg1: memref<14xf32, #tpu.memory_space<smem>>, %arg2: memref<2x8x128xf32, #tpu.memory_space<vmem>>, %arg3: memref<2x8x128xf32, #tpu.memory_space<vmem>>) attributes {dimension_semantics = [#tpu.dimension_semantics<parallel>], iteration_bounds = array<i64: 1>, scalar_prefetch = 0 : i64, scratch_operands = 0 : i64, tpu.core_type = #tpu.core_type<tc>, window_params = [{transform_indices = @transform_0, window_bounds = array<i64: 14>}, {transform_indices = @transform_1, window_bounds = array<i64: 2, 8, 128>}, {transform_indices = @transform_2, window_bounds = array<i64: 2, 8, 128>}]} {
    %c0 = arith.constant 0 : index
    %0 = memref.load %arg1[%c0] : memref<14xf32, #tpu.memory_space<smem>>
    %c1 = arith.constant 1 : index
    %1 = memref.load %arg1[%c1] : memref<14xf32, #tpu.memory_space<smem>>
    %c2 = arith.constant 2 : index
    %2 = memref.load %arg1[%c2] : memref<14xf32, #tpu.memory_space<smem>>
    %c3 = arith.constant 3 : index
    %3 = memref.load %arg1[%c3] : memref<14xf32, #tpu.memory_space<smem>>
    %c4 = arith.constant 4 : index
    %4 = memref.load %arg1[%c4] : memref<14xf32, #tpu.memory_space<smem>>
    %c5 = arith.constant 5 : index
    %5 = memref.load %arg1[%c5] : memref<14xf32, #tpu.memory_space<smem>>
    %c6 = arith.constant 6 : index
    %6 = memref.load %arg1[%c6] : memref<14xf32, #tpu.memory_space<smem>>
    %c7 = arith.constant 7 : index
    %7 = memref.load %arg1[%c7] : memref<14xf32, #tpu.memory_space<smem>>
    %c8 = arith.constant 8 : index
    %8 = memref.load %arg1[%c8] : memref<14xf32, #tpu.memory_space<smem>>
    %c9 = arith.constant 9 : index
    %9 = memref.load %arg1[%c9] : memref<14xf32, #tpu.memory_space<smem>>
    %c10 = arith.constant 10 : index
    %10 = memref.load %arg1[%c10] : memref<14xf32, #tpu.memory_space<smem>>
    %c11 = arith.constant 11 : index
    %11 = memref.load %arg1[%c11] : memref<14xf32, #tpu.memory_space<smem>>
    %c13 = arith.constant 13 : index
    %12 = memref.load %arg1[%c13] : memref<14xf32, #tpu.memory_space<smem>>
    %c0_0 = arith.constant 0 : index
    %c0_1 = arith.constant 0 : index
    %c0_2 = arith.constant 0 : index
    %13 = vector.load %arg2[%c0_0, %c0_1, %c0_2] : memref<2x8x128xf32, #tpu.memory_space<vmem>>, vector<1x8x128xf32>
    %14 = vector.shape_cast %13 : vector<1x8x128xf32> to vector<8x128xf32>
    %c1_3 = arith.constant 1 : index
    %c0_4 = arith.constant 0 : index
    %c0_5 = arith.constant 0 : index
    %15 = vector.load %arg2[%c1_3, %c0_4, %c0_5] : memref<2x8x128xf32, #tpu.memory_space<vmem>>, vector<1x8x128xf32>
    %16 = vector.shape_cast %15 : vector<1x8x128xf32> to vector<8x128xf32>
    %17 = vector.broadcast %0 : f32 to vector<8x128xf32>
    %18 = arith.subf %14, %17 : vector<8x128xf32>
    %cst = arith.constant 0.000000e+00 : f32
    %19 = vector.broadcast %cst : f32 to vector<8x128xf32>
    %20 = arith.subf %19, %18 : vector<8x128xf32>
    %21 = vector.broadcast %2 : f32 to vector<8x128xf32>
    %22 = arith.subf %14, %21 : vector<8x128xf32>
    %23 = vector.broadcast %9 : f32 to vector<8x128xf32>
    %24 = arith.mulf %22, %23 : vector<8x128xf32>
    %25 = math.exp %24 : vector<8x128xf32>
    %26 = vector.broadcast %4 : f32 to vector<8x128xf32>
    %27 = arith.mulf %26, %25 : vector<8x128xf32>
    %28 = arith.addf %20, %27 : vector<8x128xf32>
    %29 = vector.broadcast %5 : f32 to vector<8x128xf32>
    %30 = arith.mulf %29, %16 : vector<8x128xf32>
    %31 = arith.subf %28, %30 : vector<8x128xf32>
    %32 = vector.broadcast %12 : f32 to vector<8x128xf32>
    %33 = arith.addf %31, %32 : vector<8x128xf32>
    %34 = vector.broadcast %7 : f32 to vector<8x128xf32>
    %35 = arith.mulf %33, %34 : vector<8x128xf32>
    %36 = vector.broadcast %0 : f32 to vector<8x128xf32>
    %37 = arith.subf %14, %36 : vector<8x128xf32>
    %38 = vector.broadcast %6 : f32 to vector<8x128xf32>
    %39 = arith.mulf %38, %37 : vector<8x128xf32>
    %40 = arith.subf %39, %16 : vector<8x128xf32>
    %41 = vector.broadcast %8 : f32 to vector<8x128xf32>
    %42 = arith.mulf %40, %41 : vector<8x128xf32>
    %43 = vector.broadcast %3 : f32 to vector<8x128xf32>
    %44 = arith.cmpf ogt, %14, %43 : vector<8x128xf32>
    %45 = vector.broadcast %1 : f32 to vector<8x128xf32>
    %46 = arith.subf %45, %14 : vector<8x128xf32>
    %47 = vector.broadcast %10 : f32 to vector<8x128xf32>
    %48 = arith.mulf %46, %47 : vector<8x128xf32>
    %49 = arith.select %44, %48, %35 : vector<8x128xi1>, vector<8x128xf32>
    %50 = vector.broadcast %11 : f32 to vector<8x128xf32>
    %51 = arith.addf %42, %50 : vector<8x128xf32>
    %52 = arith.select %44, %51, %42 : vector<8x128xi1>, vector<8x128xf32>
    %c0_6 = arith.constant 0 : index
    %c0_7 = arith.constant 0 : index
    %c0_8 = arith.constant 0 : index
    %53 = vector.load %arg3[%c0_6, %c0_7, %c0_8] : memref<2x8x128xf32, #tpu.memory_space<vmem>>, vector<1x8x128xf32>
    %54 = vector.shape_cast %53 : vector<1x8x128xf32> to vector<8x128xf32>
    %55 = vector.shape_cast %49 : vector<8x128xf32> to vector<1x8x128xf32>
    tpu.vector_store %arg3[%c0_6, %c0_7, %c0_8], %55 {strides = array<i32>} : memref<2x8x128xf32, #tpu.memory_space<vmem>>, vector<1x8x128xf32>,
    %c1_9 = arith.constant 1 : index
    %c0_10 = arith.constant 0 : index
    %c0_11 = arith.constant 0 : index
    %56 = vector.load %arg3[%c1_9, %c0_10, %c0_11] : memref<2x8x128xf32, #tpu.memory_space<vmem>>, vector<1x8x128xf32>
    %57 = vector.shape_cast %56 : vector<1x8x128xf32> to vector<8x128xf32>
    %58 = vector.shape_cast %52 : vector<8x128xf32> to vector<1x8x128xf32>
    tpu.vector_store %arg3[%c1_9, %c0_10, %c0_11], %58 {strides = array<i32>} : memref<2x8x128xf32, #tpu.memory_space<vmem>>, vector<1x8x128xf32>,
    return
  }
  func.func @transform_0(%arg0: i32) -> i32 {
    %c0_i32 = arith.constant 0 : i32
    %c0_i32_0 = arith.constant 0 : i32
    return %c0_i32 : i32
  }
  func.func @transform_1(%arg0: i32) -> (i32, i32, i32) {
    %c0_i32 = arith.constant 0 : i32
    %c0_i32_0 = arith.constant 0 : i32
    %c0_i32_1 = arith.constant 0 : i32
    return %c0_i32, %arg0, %c0_i32_0 : i32, i32, i32
  }
  func.func @transform_2(%arg0: i32) -> (i32, i32, i32) {
    %c0_i32 = arith.constant 0 : i32
    %c0_i32_0 = arith.constant 0 : i32
    %c0_i32_1 = arith.constant 0 : i32
    return %c0_i32, %arg0, %c0_i32_0 : i32, i32, i32
  }
}

</mosaic_0001>

<bundles_post_ra>
// kernel: tpu_custom_call.1
= control target key start
LH: loop header
LB: loop body
LE: loop exit
PB: predicated region body
PF: predicated region fallthrough
CT: control target
= control target key end

     0   :  { %7 = vsyncpa [#allocation5], 0  ;;  %s242_s0 = inlined_call_operand.hbm [shape: f32[14], index: 0, kind: input, shape index: {}]   ;;  %s243_s1 = inlined_call_operand.hbm [shape: f32[2,8,128], index: 1, kind: input, shape index: {}]   ;;  %s244_s2 = inlined_call_operand.hbm [shape: f32[2,8,128], index: 2, kind: output, shape index: {}]  }
   0x1   :  { %8 = vsyncpa [#allocation3], 0 }
   0x2   :  { %9 = vsyncpa [#allocation4], 0  ;;  %s15_s11 = sshll.u32 %s242_s0, 4  ;;  %s23_s14 = sshll.u32 %s243_s1, 4  ;;  %s16_s11 = int_to_ptr.hbm [resolvable:$true] %s15_s11  ;;  %s24_s14 = int_to_ptr.hbm [resolvable:$true] %s23_s14 }
   0x3   :  { %s199_s15 = smov [#allocation2]   ;;  %s200_s16 = smov [#allocation6]  }
   0x4   :  { %18 = dma.hbm_to_smem %s16_s11, 16, %s199_s15, [#allocation5]  }
   0x5   :  { %s25_s17 = sshll.u32 %s200_s16, 4  ;;  %s201_s18 = smov 128   ;;  %s26_s17 = int_to_ptr.vmem [resolvable:$true] %s25_s17 }
   0x6   :  { %s202_s19 = smov 8  }
   0x7   :  { %31 = dma.hbm_to_vmem [thread:$0]  %s24_s14, 256, %s26_s17, [#allocation3], %s201_s18, %s201_s18, %s202_s19  }
   0x8   :  { %193 = dma.done.wait [#allocation5], 16  }
   0x9   :  { %194 = vsyncadd [#allocation5], 4294967280 }
   0xa   :  { %195 = dma.done.wait [#allocation3], 256  }
   0xb   :  { %196 = vsyncadd [#allocation3], 4294967040 }
   0xc   :  { %40 = sfence }
   0xd   :  { %s115_s0 = sld [smem:[#allocation2 + $0x2]]  ;;  %v54_v0 = vld [vmem:[#allocation6] sm:$0xff]  ;;  %v56_v10 = vld [vmem:[#allocation6 + $0x8] sm:$0xff]  ;;  %s203_s3 = smov [#allocation7]  }
   0xe   :  { %s41_s20 = sld [smem:[#allocation2]]  ;;  %s98_s4 = sshll.u32 %s203_s3, 4  ;;  %s99_s4 = int_to_ptr.vmem [resolvable:$true] %s98_s4 }
   0xf   :  { %s122_s1 = sld [smem:[#allocation2 + $0x9]]  ;;  %s100_s7 = sshll.u32 %s244_s2, 4  ;;  %s101_s7 = int_to_ptr.hbm [resolvable:$true] %s100_s7 }
  0x10   :  { %s116_s21 = sld [smem:[#allocation2 + $0x3]] }
  0x11   :  { %s119_s22 = sld [smem:[#allocation2 + $0x6]] }
  0x12   :  { %s121_s23 = sld [smem:[#allocation2 + $0x8]] }
  0x13   :  { %v60_v1 = vstv %s115_s0  ;;  %s124_s24 = sld [smem:[#allocation2 + $0xb]] }
  0x14   :  { %v61_v2 = vsub.f32 %v54_v0, %v60_v1  ;;  %v57_v3 = vstv %s41_s20  ;;  %s117_s25 = sld [smem:[#allocation2 + $0x4]] }
  0x15   :  { %v62_v4 = vstv %s122_s1  ;;  %s118_s26 = sld [smem:[#allocation2 + $0x5]]  ;;  %v58_v6 = vsub.f32 %v54_v0, %v57_v3 }
  0x16   :  { %v63_v5 = vmul.f32 %v62_v4, %v61_v2  ;;  %s114_s27 = sld [smem:[#allocation2 + $0x1]]  ;;  %v81_v12 = vstv %s116_s21 }
  0x17   :  { %v76_v8 = vstv %s119_s22  ;;  %s123_s28 = sld [smem:[#allocation2 + $0xa]]  ;;  %vm228_vm0 = vcmp.gt.f32.partialorder %v54_v0, %v81_v12  ;;  %v59_v19 = vsub.f32 0.0, %v58_v6 }
  0x18   :  { %v64_v7 = vmul.f32 1.442695, %v63_v5  ;;  %v77_v9 = vmul.f32 %v76_v8, %v58_v6  ;;  %v79_v11 = vstv %s121_s23  ;;  %s125_s29 = sld [smem:[#allocation2 + $0xd]] }
  0x19   :  { %v88_v14 = vstv %s124_s24  ;;  %s120_s30 = sld [smem:[#allocation2 + $0x7]] }
  0x1a   :  { %131 = vpow2.f32 %v64_v7  ;;  %v78_v13 = vsub.f32 %v77_v9, %v56_v10  ;;  %v66_v16 = vstv %s117_s25 }
  0x1b   :  { %v69_v17 = vstv %s118_s26 }
  0x1c   :  { %v80_v15 = vmul.f32 %v79_v11, %v78_v13  ;;  %v83_v22 = vstv %s114_s27  ;;  %v70_v24 = vmul.f32 %v69_v17, %v56_v10 }
  0x1d   :  { %v84_v27 = vsub.f32 %v83_v22, %v54_v0  ;;  %v85_v29 = vstv %s123_s28 }
  0x1e   :  { %v89_v20 = vadd.f32 %v88_v14, %v80_v15  ;;  %v72_v28 = vstv %s125_s29 }
  0x1f   :  { %v74_v31 = vstv %s120_s30  ;;  %v86_v33 = vmul.f32 %v85_v29, %v84_v27 }
  0x20   :  { %v132_v21 = vpop.eup %131  ;;  %v90_v25 = vsel %vm228_vm0, %v89_v20, %v80_v15 }
  0x21   :  { %v67_v23 = vmul.f32 %v132_v21, %v66_v16  ;;  %93 = vst [vmem:[#allocation7 + $0x8] sm:$0xff] %v90_v25 }
  0x23   :  { %v68_v26 = vadd.f32 %v67_v23, %v59_v19 }
  0x25   :  { %v71_v30 = vsub.f32 %v68_v26, %v70_v24 }
  0x27   :  { %v73_v32 = vadd.f32 %v72_v28, %v71_v30 }
  0x29   :  { %v75_v34 = vmul.f32 %v74_v31, %v73_v32 }
  0x2b   :  { %v87_v35 = vsel %vm228_vm0, %v86_v33, %v75_v34 }
  0x2c   :  { %91 = vst [vmem:[#allocation7] sm:$0xff] %v87_v35 }
  0x2d   :  { %106 = dma.vmem_to_hbm [thread:$0]  %s99_s4, 256, %s101_s7, [#allocation4], %s201_s18, %s201_s18, %s202_s19  }
  0x2e   :  { %197 = dma.done.wait [#allocation4], 256  }
  0x2f   :  { %198 = vsyncadd [#allocation4], 4294967040 }
  0x30   :  { %111 = vsyncpa [#allocation3], 1 }
  0x31   :  { %112 = vsyncpa [#allocation4], 1 }
  0x32   :  { %113 = vsyncpa [#allocation5], 1 }

</bundles_post_ra>
